<compile_context>
chip_gen: v6e
topology: v6e:2x2x1
jax: 0.10.0
libtpu: 0.0.40
codegen_flags: <defaults>
</compile_context>

<pallas_src>
import functools
import math

import jax
import jax.numpy as jnp
from jax.experimental import pallas as pl
from jax.experimental.pallas import tpu as pltpu

_DICE_SMOOTH = 1e-5
_BCE_EPS = 1e-12
_LOG_CLAMP = -100.0  # torch F.binary_cross_entropy clamps log() at -100
_W0 = 0.5            # WeightedBCE / WeightedDiceLoss inner weights=[0.5, 0.5]
_W1 = 0.5            # (fixed by the module ctor; the 0.25 dice fold relies on it)


def _dice_bce_partials_kernel(p_ref, t_ref, out_ref,
                              pt_acc, sq_acc, pbce_acc, nbce_acc,
                              pcnt_acc, ncnt_acc,
                              *, valid_units, units_per_tile, tiles_per_par,
                              needs_mask):
    """Streams one (par, step) tile and accumulates 6 per-sample partial sums.

    The input block is either (B, TN) lane tiles or (B, TR, 128) row tiles; in
    both cases dim 1 is the tiled reduction axis ("units" = lanes or rows).
    """
    par = pl.program_id(0)
    step = pl.program_id(1)
    accs = (pt_acc, sq_acc, pbce_acc, nbce_acc, pcnt_acc, ncnt_acc)

    @pl.when(step == 0)
    def _init():
        for acc in accs:
            acc[...] = jnp.zeros_like(acc)

    def _row_sum(x):
        # Reduce every non-batch axis -> (B, 1); stays >= 2-D throughout.
        while x.ndim > 2:
            x = jnp.sum(x, axis=1)
        return jnp.sum(x, axis=1, keepdims=True)

    def _accumulate(apply_mask):
        p = p_ref[...].astype(jnp.float32)
        t = t_ref[...].astype(jnp.float32)
        if apply_mask:
            start = (par * tiles_per_par + step) * units_per_tile
            unit = jax.lax.broadcasted_iota(jnp.int32, p.shape, 1) + start
            valid = unit < valid_units
            p = jnp.where(valid, p, 0.0)
            t = jnp.where(valid, t, 0.0)

        # Dice partial sums (the [0.5, 0.5] weight fold -> 0.25 happens outside).
        pt_acc[...] += _row_sum(p * t)
        sq_acc[...] += _row_sum(p * p + t * t)

        # BCE partial sums; accumulate the UN-negated form (negate once outside).
        log_p = jnp.maximum(jnp.log(p), _LOG_CLAMP)
        log_1mp = jnp.maximum(jnp.log(1.0 - p), _LOG_CLAMP)
        mbce = log_1mp + t * (log_p - log_1mp)          # == -bce per element
        pos = t > 0.5                                   # masked lanes have t == 0
        neg = t < 0.5
        if apply_mask:
            neg = jnp.logical_and(neg, valid)
        posf = pos.astype(jnp.float32)
        negf = neg.astype(jnp.float32)
        pbce_acc[...] += _row_sum(posf * mbce)
        nbce_acc[...] += _row_sum(negf * mbce)
        pcnt_acc[...] += _row_sum(posf)
        ncnt_acc[...] += _row_sum(negf)

    if not needs_mask:
        _accumulate(False)
    else:
        tile_start = (par * tiles_per_par + step) * units_per_tile
        is_full = tile_start + units_per_tile <= valid_units

        @pl.when(is_full)
        def _full_tile():
            _accumulate(False)

        @pl.when(jnp.logical_not(is_full))
        def _edge_tile():
            _accumulate(True)

    @pl.when(step == pl.num_programs(1) - 1)
    def _finalize():
        # out_ref block is (B, 6) (leading parallel-chunk dim squeezed).
        for k, acc in enumerate(accs):
            out_ref[:, k:k + 1] = acc[...]


def weighted_dice_bce(inputs, targets, dice_weight=0.5, bce_weight=0.5,
                      *, max_block_bytes=None):
    """Pallas TPU implementation of WeightedDiceBCE.forward.

    `inputs` must already be probabilities in (0, 1) (post-sigmoid), exactly as
    required by torch.nn.functional.binary_cross_entropy in the reference.
    The inner Dice/BCE weights are the module's fixed [0.5, 0.5]; only the
    outer dice_weight / bce_weight combination is configurable.
    """
    assert inputs.shape == targets.shape
    b = inputs.shape[0]
    n = int(math.prod(inputs.shape[1:]))

    # Flatten only (free reshape). No pad, no dtype copy: the kernel casts per
    # tile and masks ragged edges, so HBM is read exactly once per input.
    p = jnp.reshape(inputs, (b, n))
    t = jnp.reshape(targets, (b, n))

    # Per-generation sizing. Default scoped VMEM: 16 MiB (v5e) / 32 MiB
    # (v6e, v7x); physical: 128 MiB (v5e, v6e) / 64 MiB (v7x) -- v7x's physical
    # ceiling is the real constraint, so budget off the reported capacity.
    try:
        vmem_cap = int(pltpu.get_tpu_info().vmem_capacity_bytes)
    except Exception:  # conservative fallback (v7x-sized)
        vmem_cap = 64 << 20
    if max_block_bytes is None:
        max_block_bytes = min(4 << 20, vmem_cap // 16)   # per input, per block
    vmem_limit = int(min(vmem_cap * 3 // 4, 96 << 20))

    itemsize = max(p.dtype.itemsize, t.dtype.itemsize)
    sub_mult = 8 * max(1, 4 // max(1, min(p.dtype.itemsize, t.dtype.itemsize)))

    if n % 128 == 0:
        # Row-tiled layout (B, R, 128): full sublane packing even for tiny B.
        r = n // 128
        row_bytes = b * 128 * itemsize
        tile = max(sub_mult,
                   (max_block_bytes // max(row_bytes, 1)) // sub_mult * sub_mult)
        tile = min(tile, r)
        arrays = (p.reshape(b, r, 128), t.reshape(b, r, 128))
        block = (b, tile, 128)
        valid_units = r
    else:
        # Fallback: lane-tiled layout (B, TN).
        # TODO(synk): small B underfills sublanes on this path; only taken when
        # the flattened feature size is not a multiple of 128.
        lane = 128
        n_lane = pl.cdiv(n, lane) * lane
        elems = max_block_bytes // itemsize
        tile = max(lane, (elems // max(b, 1)) // lane * lane)
        tile = min(tile, n_lane)
        arrays = (p, t)
        block = (b, tile)
        valid_units = n

    num_tiles = pl.cdiv(valid_units, tile)
    num_par = 2 if num_tiles >= 2 else 1            # engage both v7x TensorCores
    tiles_per_par = pl.cdiv(num_tiles, num_par)
    needs_mask = (valid_units % tile != 0) or (num_par * tiles_per_par != num_tiles)
    last_tile = num_tiles - 1

    if len(block) == 3:
        imap = lambda i, j: (0, jnp.minimum(i * tiles_per_par + j, last_tile), 0)
    else:
        imap = lambda i, j: (0, jnp.minimum(i * tiles_per_par + j, last_tile))

    kernel = functools.partial(
        _dice_bce_partials_kernel,
        valid_units=valid_units, units_per_tile=tile,
        tiles_per_par=tiles_per_par, needs_mask=needs_mask)

    partials = pl.pallas_call(
        kernel,
        out_shape=jax.ShapeDtypeStruct((num_par, b, 6), jnp.float32),
        grid_spec=pltpu.PrefetchScalarGridSpec(
            num_scalar_prefetch=0,
            grid=(num_par, tiles_per_par),
            in_specs=[pl.BlockSpec(block, imap),
                      pl.BlockSpec(block, imap)],
            out_specs=pl.BlockSpec((None, b, 6), lambda i, j: (i, 0, 0)),
            scratch_shapes=[pltpu.VMEM((b, 1), jnp.float32)] * 6,
        ),
        compiler_params=pltpu.CompilerParams(
            dimension_semantics=("parallel", "arbitrary"),
            vmem_limit_bytes=vmem_limit),
    )(*arrays)

    # Tiny JAX epilogue: combine per-chunk partials + final scalar math.
    sums = jnp.sum(partials, axis=0)                    # (B, 6)
    # WeightedDiceLoss with weights [0.5, 0.5]: w == 0.5 -> 0.25 fold, eps after.
    inter = 0.25 * sums[:, 0]
    union = 0.25 * sums[:, 1]
    dice_b = 1.0 - (2.0 * inter + _DICE_SMOOTH) / (union + _DICE_SMOOTH)
    dice_loss = jnp.mean(dice_b)
    pos_bce = -jnp.sum(sums[:, 2])                      # kernel accumulated -bce
    neg_bce = -jnp.sum(sums[:, 3])
    pos_cnt = jnp.sum(sums[:, 4])
    neg_cnt = jnp.sum(sums[:, 5])
    bce_loss = (_W0 * pos_bce / (pos_cnt + _BCE_EPS)
                + _W1 * neg_bce / (neg_cnt + _BCE_EPS))
    return dice_weight * dice_loss + bce_weight * bce_loss


def _reference(inputs, targets, dice_weight=0.5, bce_weight=0.5):
    """Pure-JAX mirror of the torch module, for correctness checking."""
    b = inputs.shape[0]
    p = jnp.reshape(inputs, (b, -1)).astype(jnp.float32)
    t = jnp.reshape(targets, (b, -1)).astype(jnp.float32)
    # WeightedDiceLoss(weights=[0.5, 0.5])
    w = t * (_W1 - _W0) + _W0
    pw, tw = w * p, w * t
    inter = jnp.sum(pw * tw, axis=-1)
    union = jnp.sum(pw * pw, axis=-1) + jnp.sum(tw * tw, axis=-1)
    dice = jnp.mean(1.0 - (2.0 * inter + _DICE_SMOOTH) / (union + _DICE_SMOOTH))
    # WeightedBCE(weights=[0.5, 0.5])
    pf, tf = p.reshape(-1), t.reshape(-1)
    log_p = jnp.maximum(jnp.log(pf), _LOG_CLAMP)
    log_1mp = jnp.maximum(jnp.log(1.0 - pf), _LOG_CLAMP)
    bce = -(tf * log_p + (1.0 - tf) * log_1mp)
    pos = (tf > 0.5).astype(jnp.float32)
    neg = (tf < 0.5).astype(jnp.float32)
    bce_loss = jnp.sum(_W0 * pos * bce / (jnp.sum(pos) + _BCE_EPS)
                       + _W1 * neg * bce / (jnp.sum(neg) + _BCE_EPS))
    return dice_weight * dice + bce_weight * bce_loss


if __name__ == "__main__":
    key = jax.random.PRNGKey(0)

    # (shape, max_block_bytes override) — exercise the main row-tiled path, the
    # lane-tiled ragged fallback, and the 2-chunk parallel split with a
    # clamped phantom tile.
    checks = [
        ((2, 4, 16, 16), None),              # N=1024: row-tiled, single tile
        ((2, 3, 7, 11), None),               # N=231: lane-tiled + edge mask
        ((2, 5, 32, 32), 2 * 8 * 128 * 4),   # N=5120: 5 row tiles, split + phantom
    ]
    for idx, (shape, blk) in enumerate(checks):
        k_in, k_tg = jax.random.split(jax.random.fold_in(key, idx))
        # Post-sigmoid probabilities (as the torch module expects) + binary masks.
        inputs = jax.nn.sigmoid(jax.random.normal(k_in, shape, jnp.float32))
        targets = (jax.random.uniform(k_tg, shape) > 0.5).astype(jnp.float32)

        loss = jax.block_until_ready(
            weighted_dice_bce(inputs, targets, max_block_bytes=blk))
        ref = jax.block_until_ready(_reference(inputs, targets))
        if not jnp.allclose(loss, ref, rtol=1e-3, atol=1e-5):
            raise AssertionError(
                f"mismatch at {shape}: pallas={float(loss)} ref={float(ref)}")
    print("KERNEL_OK")
</pallas_src>

<mosaic_0001>
module attributes {stable_mosaic.version = 11 : i64} {
  func.func @_dice_bce_partials_kernel(%arg0: i32, %arg1: i32, %arg2: memref<2x8x128xf32, #tpu.memory_space<vmem>>, %arg3: memref<2x8x128xf32, #tpu.memory_space<vmem>>, %arg4: memref<1x2x6xf32, #tpu.memory_space<vmem>>, %arg5: memref<2x1xf32, #tpu.memory_space<vmem>>, %arg6: memref<2x1xf32, #tpu.memory_space<vmem>>, %arg7: memref<2x1xf32, #tpu.memory_space<vmem>>, %arg8: memref<2x1xf32, #tpu.memory_space<vmem>>, %arg9: memref<2x1xf32, #tpu.memory_space<vmem>>, %arg10: memref<2x1xf32, #tpu.memory_space<vmem>>) attributes {dimension_semantics = [#tpu.dimension_semantics<parallel>, #tpu.dimension_semantics<arbitrary>], iteration_bounds = array<i64: 1, 1>, scalar_prefetch = 0 : i64, scratch_operands = 6 : i64, tpu.core_type = #tpu.core_type<tc>, window_params = [{transform_indices = @transform_0, window_bounds = array<i64: 2, 8, 128>}, {transform_indices = @transform_1, window_bounds = array<i64: 2, 8, 128>}, {transform_indices = @transform_2, window_bounds = array<i64: 1, 2, 6>}]} {
    %c0_i32 = arith.constant 0 : i32
    %0 = arith.cmpi eq, %arg1, %c0_i32 : i32
    %1 = arith.extui %0 : i1 to i32
    %c0_i32_0 = arith.constant 0 : i32
    %2 = arith.cmpi ne, %1, %c0_i32_0 : i32
    scf.if %2 {
      %cst_48 = arith.constant 0.000000e+00 : f32
      %69 = vector.broadcast %cst_48 : f32 to vector<2x1xf32>
      %c0_49 = arith.constant 0 : index
      %c0_50 = arith.constant 0 : index
      %70 = vector.load %arg5[%c0_49, %c0_50] : memref<2x1xf32, #tpu.memory_space<vmem>>, vector<2x1xf32>
      tpu.vector_store %arg5[%c0_49, %c0_50], %69 {strides = array<i32>} : memref<2x1xf32, #tpu.memory_space<vmem>>, vector<2x1xf32>,
      %cst_51 = arith.constant 0.000000e+00 : f32
      %71 = vector.broadcast %cst_51 : f32 to vector<2x1xf32>
      %c0_52 = arith.constant 0 : index
      %c0_53 = arith.constant 0 : index
      %72 = vector.load %arg6[%c0_52, %c0_53] : memref<2x1xf32, #tpu.memory_space<vmem>>, vector<2x1xf32>
      tpu.vector_store %arg6[%c0_52, %c0_53], %71 {strides = array<i32>} : memref<2x1xf32, #tpu.memory_space<vmem>>, vector<2x1xf32>,
      %cst_54 = arith.constant 0.000000e+00 : f32
      %73 = vector.broadcast %cst_54 : f32 to vector<2x1xf32>
      %c0_55 = arith.constant 0 : index
      %c0_56 = arith.constant 0 : index
      %74 = vector.load %arg7[%c0_55, %c0_56] : memref<2x1xf32, #tpu.memory_space<vmem>>, vector<2x1xf32>
      tpu.vector_store %arg7[%c0_55, %c0_56], %73 {strides = array<i32>} : memref<2x1xf32, #tpu.memory_space<vmem>>, vector<2x1xf32>,
      %cst_57 = arith.constant 0.000000e+00 : f32
      %75 = vector.broadcast %cst_57 : f32 to vector<2x1xf32>
      %c0_58 = arith.constant 0 : index
      %c0_59 = arith.constant 0 : index
      %76 = vector.load %arg8[%c0_58, %c0_59] : memref<2x1xf32, #tpu.memory_space<vmem>>, vector<2x1xf32>
      tpu.vector_store %arg8[%c0_58, %c0_59], %75 {strides = array<i32>} : memref<2x1xf32, #tpu.memory_space<vmem>>, vector<2x1xf32>,
      %cst_60 = arith.constant 0.000000e+00 : f32
      %77 = vector.broadcast %cst_60 : f32 to vector<2x1xf32>
      %c0_61 = arith.constant 0 : index
      %c0_62 = arith.constant 0 : index
      %78 = vector.load %arg9[%c0_61, %c0_62] : memref<2x1xf32, #tpu.memory_space<vmem>>, vector<2x1xf32>
      tpu.vector_store %arg9[%c0_61, %c0_62], %77 {strides = array<i32>} : memref<2x1xf32, #tpu.memory_space<vmem>>, vector<2x1xf32>,
      %cst_63 = arith.constant 0.000000e+00 : f32
      %79 = vector.broadcast %cst_63 : f32 to vector<2x1xf32>
      %c0_64 = arith.constant 0 : index
      %c0_65 = arith.constant 0 : index
      %80 = vector.load %arg10[%c0_64, %c0_65] : memref<2x1xf32, #tpu.memory_space<vmem>>, vector<2x1xf32>
      tpu.vector_store %arg10[%c0_64, %c0_65], %79 {strides = array<i32>} : memref<2x1xf32, #tpu.memory_space<vmem>>, vector<2x1xf32>,
    } else {
    }
    %c0 = arith.constant 0 : index
    %c0_1 = arith.constant 0 : index
    %c0_2 = arith.constant 0 : index
    %3 = vector.load %arg2[%c0, %c0_1, %c0_2] : memref<2x8x128xf32, #tpu.memory_space<vmem>>, vector<2x8x128xf32>
    %c0_3 = arith.constant 0 : index
    %c0_4 = arith.constant 0 : index
    %c0_5 = arith.constant 0 : index
    %4 = vector.load %arg3[%c0_3, %c0_4, %c0_5] : memref<2x8x128xf32, #tpu.memory_space<vmem>>, vector<2x8x128xf32>
    %c0_6 = arith.constant 0 : index
    %c0_7 = arith.constant 0 : index
    %5 = vector.load %arg5[%c0_6, %c0_7] : memref<2x1xf32, #tpu.memory_space<vmem>>, vector<2x1xf32>
    %6 = arith.mulf %3, %4 : vector<2x8x128xf32>
    %cst = arith.constant dense<0.000000e+00> : vector<2x128xf32>
    %7 = vector.multi_reduction <add>, %6, %cst [1] : vector<2x8x128xf32> to vector<2x128xf32>
    %cst_8 = arith.constant dense<0.000000e+00> : vector<2xf32>
    %8 = vector.multi_reduction <add>, %7, %cst_8 [1] : vector<2x128xf32> to vector<2xf32>
    %9 = vector.shape_cast %8 : vector<2xf32> to vector<2x1xf32>
    %10 = arith.addf %5, %9 : vector<2x1xf32>
    %c0_9 = arith.constant 0 : index
    %c0_10 = arith.constant 0 : index
    %11 = vector.load %arg5[%c0_9, %c0_10] : memref<2x1xf32, #tpu.memory_space<vmem>>, vector<2x1xf32>
    tpu.vector_store %arg5[%c0_9, %c0_10], %10 {strides = array<i32>} : memref<2x1xf32, #tpu.memory_space<vmem>>, vector<2x1xf32>,
    %c0_11 = arith.constant 0 : index
    %c0_12 = arith.constant 0 : index
    %12 = vector.load %arg6[%c0_11, %c0_12] : memref<2x1xf32, #tpu.memory_space<vmem>>, vector<2x1xf32>
    %13 = arith.mulf %3, %3 : vector<2x8x128xf32>
    %14 = arith.mulf %4, %4 : vector<2x8x128xf32>
    %15 = arith.addf %13, %14 : vector<2x8x128xf32>
    %cst_13 = arith.constant dense<0.000000e+00> : vector<2x128xf32>
    %16 = vector.multi_reduction <add>, %15, %cst_13 [1] : vector<2x8x128xf32> to vector<2x128xf32>
    %cst_14 = arith.constant dense<0.000000e+00> : vector<2xf32>
    %17 = vector.multi_reduction <add>, %16, %cst_14 [1] : vector<2x128xf32> to vector<2xf32>
    %18 = vector.shape_cast %17 : vector<2xf32> to vector<2x1xf32>
    %19 = arith.addf %12, %18 : vector<2x1xf32>
    %c0_15 = arith.constant 0 : index
    %c0_16 = arith.constant 0 : index
    %20 = vector.load %arg6[%c0_15, %c0_16] : memref<2x1xf32, #tpu.memory_space<vmem>>, vector<2x1xf32>
    tpu.vector_store %arg6[%c0_15, %c0_16], %19 {strides = array<i32>} : memref<2x1xf32, #tpu.memory_space<vmem>>, vector<2x1xf32>,
    %21 = math.log %3 : vector<2x8x128xf32>
    %cst_17 = arith.constant -1.000000e+02 : f32
    %22 = vector.broadcast %cst_17 : f32 to vector<2x8x128xf32>
    %23 = arith.maximumf %21, %22 : vector<2x8x128xf32>
    %cst_18 = arith.constant 1.000000e+00 : f32
    %24 = vector.broadcast %cst_18 : f32 to vector<2x8x128xf32>
    %25 = arith.subf %24, %3 : vector<2x8x128xf32>
    %26 = math.log %25 : vector<2x8x128xf32>
    %cst_19 = arith.constant -1.000000e+02 : f32
    %27 = vector.broadcast %cst_19 : f32 to vector<2x8x128xf32>
    %28 = arith.maximumf %26, %27 : vector<2x8x128xf32>
    %29 = arith.subf %23, %28 : vector<2x8x128xf32>
    %30 = arith.mulf %4, %29 : vector<2x8x128xf32>
    %31 = arith.addf %28, %30 : vector<2x8x128xf32>
    %cst_20 = arith.constant 5.000000e-01 : f32
    %32 = vector.broadcast %cst_20 : f32 to vector<2x8x128xf32>
    %33 = arith.cmpf ogt, %4, %32 : vector<2x8x128xf32>
    %cst_21 = arith.constant 5.000000e-01 : f32
    %34 = vector.broadcast %cst_21 : f32 to vector<2x8x128xf32>
    %35 = arith.cmpf olt, %4, %34 : vector<2x8x128xf32>
    %36 = arith.extui %33 : vector<2x8x128xi1> to vector<2x8x128xi32>
    %37 = arith.sitofp %36 : vector<2x8x128xi32> to vector<2x8x128xf32>
    %38 = arith.extui %35 : vector<2x8x128xi1> to vector<2x8x128xi32>
    %39 = arith.sitofp %38 : vector<2x8x128xi32> to vector<2x8x128xf32>
    %c0_22 = arith.constant 0 : index
    %c0_23 = arith.constant 0 : index
    %40 = vector.load %arg7[%c0_22, %c0_23] : memref<2x1xf32, #tpu.memory_space<vmem>>, vector<2x1xf32>
    %41 = arith.mulf %37, %31 : vector<2x8x128xf32>
    %cst_24 = arith.constant dense<0.000000e+00> : vector<2x128xf32>
    %42 = vector.multi_reduction <add>, %41, %cst_24 [1] : vector<2x8x128xf32> to vector<2x128xf32>
    %cst_25 = arith.constant dense<0.000000e+00> : vector<2xf32>
    %43 = vector.multi_reduction <add>, %42, %cst_25 [1] : vector<2x128xf32> to vector<2xf32>
    %44 = vector.shape_cast %43 : vector<2xf32> to vector<2x1xf32>
    %45 = arith.addf %40, %44 : vector<2x1xf32>
    %c0_26 = arith.constant 0 : index
    %c0_27 = arith.constant 0 : index
    %46 = vector.load %arg7[%c0_26, %c0_27] : memref<2x1xf32, #tpu.memory_space<vmem>>, vector<2x1xf32>
    tpu.vector_store %arg7[%c0_26, %c0_27], %45 {strides = array<i32>} : memref<2x1xf32, #tpu.memory_space<vmem>>, vector<2x1xf32>,
    %c0_28 = arith.constant 0 : index
    %c0_29 = arith.constant 0 : index
    %47 = vector.load %arg8[%c0_28, %c0_29] : memref<2x1xf32, #tpu.memory_space<vmem>>, vector<2x1xf32>
    %48 = arith.mulf %39, %31 : vector<2x8x128xf32>
    %cst_30 = arith.constant dense<0.000000e+00> : vector<2x128xf32>
    %49 = vector.multi_reduction <add>, %48, %cst_30 [1] : vector<2x8x128xf32> to vector<2x128xf32>
    %cst_31 = arith.constant dense<0.000000e+00> : vector<2xf32>
    %50 = vector.multi_reduction <add>, %49, %cst_31 [1] : vector<2x128xf32> to vector<2xf32>
    %51 = vector.shape_cast %50 : vector<2xf32> to vector<2x1xf32>
    %52 = arith.addf %47, %51 : vector<2x1xf32>
    %c0_32 = arith.constant 0 : index
    %c0_33 = arith.constant 0 : index
    %53 = vector.load %arg8[%c0_32, %c0_33] : memref<2x1xf32, #tpu.memory_space<vmem>>, vector<2x1xf32>
    tpu.vector_store %arg8[%c0_32, %c0_33], %52 {strides = array<i32>} : memref<2x1xf32, #tpu.memory_space<vmem>>, vector<2x1xf32>,
    %c0_34 = arith.constant 0 : index
    %c0_35 = arith.constant 0 : index
    %54 = vector.load %arg9[%c0_34, %c0_35] : memref<2x1xf32, #tpu.memory_space<vmem>>, vector<2x1xf32>
    %cst_36 = arith.constant dense<0.000000e+00> : vector<2x128xf32>
    %55 = vector.multi_reduction <add>, %37, %cst_36 [1] : vector<2x8x128xf32> to vector<2x128xf32>
    %cst_37 = arith.constant dense<0.000000e+00> : vector<2xf32>
    %56 = vector.multi_reduction <add>, %55, %cst_37 [1] : vector<2x128xf32> to vector<2xf32>
    %57 = vector.shape_cast %56 : vector<2xf32> to vector<2x1xf32>
    %58 = arith.addf %54, %57 : vector<2x1xf32>
    %c0_38 = arith.constant 0 : index
    %c0_39 = arith.constant 0 : index
    %59 = vector.load %arg9[%c0_38, %c0_39] : memref<2x1xf32, #tpu.memory_space<vmem>>, vector<2x1xf32>
    tpu.vector_store %arg9[%c0_38, %c0_39], %58 {strides = array<i32>} : memref<2x1xf32, #tpu.memory_space<vmem>>, vector<2x1xf32>,
    %c0_40 = arith.constant 0 : index
    %c0_41 = arith.constant 0 : index
    %60 = vector.load %arg10[%c0_40, %c0_41] : memref<2x1xf32, #tpu.memory_space<vmem>>, vector<2x1xf32>
    %cst_42 = arith.constant dense<0.000000e+00> : vector<2x128xf32>
    %61 = vector.multi_reduction <add>, %39, %cst_42 [1] : vector<2x8x128xf32> to vector<2x128xf32>
    %cst_43 = arith.constant dense<0.000000e+00> : vector<2xf32>
    %62 = vector.multi_reduction <add>, %61, %cst_43 [1] : vector<2x128xf32> to vector<2xf32>
    %63 = vector.shape_cast %62 : vector<2xf32> to vector<2x1xf32>
    %64 = arith.addf %60, %63 : vector<2x1xf32>
    %c0_44 = arith.constant 0 : index
    %c0_45 = arith.constant 0 : index
    %65 = vector.load %arg10[%c0_44, %c0_45] : memref<2x1xf32, #tpu.memory_space<vmem>>, vector<2x1xf32>
    tpu.vector_store %arg10[%c0_44, %c0_45], %64 {strides = array<i32>} : memref<2x1xf32, #tpu.memory_space<vmem>>, vector<2x1xf32>,
    %c0_i32_46 = arith.constant 0 : i32
    %66 = arith.cmpi eq, %arg1, %c0_i32_46 : i32
    %67 = arith.extui %66 : i1 to i32
    %c0_i32_47 = arith.constant 0 : i32
    %68 = arith.cmpi ne, %67, %c0_i32_47 : i32
    scf.if %68 {
      %c0_48 = arith.constant 0 : index
      %c0_49 = arith.constant 0 : index
      %69 = vector.load %arg5[%c0_48, %c0_49] : memref<2x1xf32, #tpu.memory_space<vmem>>, vector<2x1xf32>
      %c0_50 = arith.constant 0 : index
      %c0_51 = arith.constant 0 : index
      %c0_52 = arith.constant 0 : index
      %70 = vector.load %arg4[%c0_50, %c0_51, %c0_52] : memref<1x2x6xf32, #tpu.memory_space<vmem>>, vector<1x2x1xf32>
      %71 = vector.shape_cast %70 : vector<1x2x1xf32> to vector<2x1xf32>
      %72 = vector.shape_cast %69 : vector<2x1xf32> to vector<1x2x1xf32>
      tpu.vector_store %arg4[%c0_50, %c0_51, %c0_52], %72 {strides = array<i32>} : memref<1x2x6xf32, #tpu.memory_space<vmem>>, vector<1x2x1xf32>,
      %c0_53 = arith.constant 0 : index
      %c0_54 = arith.constant 0 : index
      %73 = vector.load %arg6[%c0_53, %c0_54] : memref<2x1xf32, #tpu.memory_space<vmem>>, vector<2x1xf32>
      %c0_55 = arith.constant 0 : index
      %c0_56 = arith.constant 0 : index
      %c1 = arith.constant 1 : index
      %74 = vector.load %arg4[%c0_55, %c0_56, %c1] : memref<1x2x6xf32, #tpu.memory_space<vmem>>, vector<1x2x1xf32>
      %75 = vector.shape_cast %74 : vector<1x2x1xf32> to vector<2x1xf32>
      %76 = vector.shape_cast %73 : vector<2x1xf32> to vector<1x2x1xf32>
      tpu.vector_store %arg4[%c0_55, %c0_56, %c1], %76 {strides = array<i32>} : memref<1x2x6xf32, #tpu.memory_space<vmem>>, vector<1x2x1xf32>,
      %c0_57 = arith.constant 0 : index
      %c0_58 = arith.constant 0 : index
      %77 = vector.load %arg7[%c0_57, %c0_58] : memref<2x1xf32, #tpu.memory_space<vmem>>, vector<2x1xf32>
      %c0_59 = arith.constant 0 : index
      %c0_60 = arith.constant 0 : index
      %c2 = arith.constant 2 : index
      %78 = vector.load %arg4[%c0_59, %c0_60, %c2] : memref<1x2x6xf32, #tpu.memory_space<vmem>>, vector<1x2x1xf32>
      %79 = vector.shape_cast %78 : vector<1x2x1xf32> to vector<2x1xf32>
      %80 = vector.shape_cast %77 : vector<2x1xf32> to vector<1x2x1xf32>
      tpu.vector_store %arg4[%c0_59, %c0_60, %c2], %80 {strides = array<i32>} : memref<1x2x6xf32, #tpu.memory_space<vmem>>, vector<1x2x1xf32>,
      %c0_61 = arith.constant 0 : index
      %c0_62 = arith.constant 0 : index
      %81 = vector.load %arg8[%c0_61, %c0_62] : memref<2x1xf32, #tpu.memory_space<vmem>>, vector<2x1xf32>
      %c0_63 = arith.constant 0 : index
      %c0_64 = arith.constant 0 : index
      %c3 = arith.constant 3 : index
      %82 = vector.load %arg4[%c0_63, %c0_64, %c3] : memref<1x2x6xf32, #tpu.memory_space<vmem>>, vector<1x2x1xf32>
      %83 = vector.shape_cast %82 : vector<1x2x1xf32> to vector<2x1xf32>
      %84 = vector.shape_cast %81 : vector<2x1xf32> to vector<1x2x1xf32>
      tpu.vector_store %arg4[%c0_63, %c0_64, %c3], %84 {strides = array<i32>} : memref<1x2x6xf32, #tpu.memory_space<vmem>>, vector<1x2x1xf32>,
      %c0_65 = arith.constant 0 : index
      %c0_66 = arith.constant 0 : index
      %85 = vector.load %arg9[%c0_65, %c0_66] : memref<2x1xf32, #tpu.memory_space<vmem>>, vector<2x1xf32>
      %c0_67 = arith.constant 0 : index
      %c0_68 = arith.constant 0 : index
      %c4 = arith.constant 4 : index
      %86 = vector.load %arg4[%c0_67, %c0_68, %c4] : memref<1x2x6xf32, #tpu.memory_space<vmem>>, vector<1x2x1xf32>
      %87 = vector.shape_cast %86 : vector<1x2x1xf32> to vector<2x1xf32>
      %88 = vector.shape_cast %85 : vector<2x1xf32> to vector<1x2x1xf32>
      tpu.vector_store %arg4[%c0_67, %c0_68, %c4], %88 {strides = array<i32>} : memref<1x2x6xf32, #tpu.memory_space<vmem>>, vector<1x2x1xf32>,
      %c0_69 = arith.constant 0 : index
      %c0_70 = arith.constant 0 : index
      %89 = vector.load %arg10[%c0_69, %c0_70] : memref<2x1xf32, #tpu.memory_space<vmem>>, vector<2x1xf32>
      %c0_71 = arith.constant 0 : index
      %c0_72 = arith.constant 0 : index
      %c5 = arith.constant 5 : index
      %90 = vector.load %arg4[%c0_71, %c0_72, %c5] : memref<1x2x6xf32, #tpu.memory_space<vmem>>, vector<1x2x1xf32>
      %91 = vector.shape_cast %90 : vector<1x2x1xf32> to vector<2x1xf32>
      %92 = vector.shape_cast %89 : vector<2x1xf32> to vector<1x2x1xf32>
      tpu.vector_store %arg4[%c0_71, %c0_72, %c5], %92 {strides = array<i32>} : memref<1x2x6xf32, #tpu.memory_space<vmem>>, vector<1x2x1xf32>,
    } else {
    }
    return
  }
  func.func @transform_0(%arg0: i32, %arg1: i32) -> (i32, i32, i32) {
    %c1_i32 = arith.constant 1 : i32
    %0 = arith.muli %arg0, %c1_i32 : i32
    %1 = arith.addi %0, %arg1 : i32
    %c0_i32 = arith.constant 0 : i32
    %2 = arith.minsi %1, %c0_i32 : i32
    %c0_i32_0 = arith.constant 0 : i32
    %c0_i32_1 = arith.constant 0 : i32
    %c0_i32_2 = arith.constant 0 : i32
    return %c0_i32_0, %2, %c0_i32_1 : i32, i32, i32
  }
  func.func @transform_1(%arg0: i32, %arg1: i32) -> (i32, i32, i32) {
    %c1_i32 = arith.constant 1 : i32
    %0 = arith.muli %arg0, %c1_i32 : i32
    %1 = arith.addi %0, %arg1 : i32
    %c0_i32 = arith.constant 0 : i32
    %2 = arith.minsi %1, %c0_i32 : i32
    %c0_i32_0 = arith.constant 0 : i32
    %c0_i32_1 = arith.constant 0 : i32
    %c0_i32_2 = arith.constant 0 : i32
    return %c0_i32_0, %2, %c0_i32_1 : i32, i32, i32
  }
  func.func @transform_2(%arg0: i32, %arg1: i32) -> (i32, i32, i32) {
    %c0_i32 = arith.constant 0 : i32
    %c0_i32_0 = arith.constant 0 : i32
    %c0_i32_1 = arith.constant 0 : i32
    return %arg0, %c0_i32, %c0_i32_0 : i32, i32, i32
  }
}

</mosaic_0001>

<bundles_post_ra>
// kernel: tpu_custom_call.1
= control target key start
LH: loop header
LB: loop body
LE: loop exit
PB: predicated region body
PF: predicated region fallthrough
CT: control target
= control target key end

     0   :  { %7 = vsyncpa [#allocation9], 0  ;;  %s475_s0 = inlined_call_operand.hbm [shape: f32[2,8,128], index: 0, kind: input, shape index: {}]   ;;  %s476_s1 = inlined_call_operand.hbm [shape: f32[2,8,128], index: 1, kind: input, shape index: {}]   ;;  %s477_s2 = inlined_call_operand.hbm [shape: f32[1,2,6], index: 2, kind: output, shape index: {}]  }
   0x1   :  { %8 = vsyncpa [#allocation12], 0 }
   0x2   :  { %9 = vsyncpa [#allocation10], 0  ;;  %s399_s9 = smov [#allocation8]  }
   0x3   :  { %s20_s10 = sshll.u32 %s399_s9, 4  ;;  %s21_s10 = int_to_ptr.vmem [resolvable:$true] %s20_s10 }
   0x4   :  { %s341_s11 = scalar_lea.vmem %s21_s10, 256  ;;  %p346_p1 = scmp.lt.s32.totalorder %s21_s10, %s21_s10 }
   0x5   :  { %p342_p0 = scmp.ne.s32.totalorder %s21_s10, %s341_s11  ;;  %p347_p2 = scmp.lt.s32.totalorder %s341_s11, %s341_s11 }
   0x7   :  { %p348_p3 = por %p347_p2, %p346_p1 }
   0x9   :  { %p349_p4 = pnand %p348_p3, %p342_p0 }
   0xb   :  { %352 = shalt.err (!%p349_p4)
}
   0xc   :  { %s400_s12 = smov 128   ;;  %s401_s13 = smov 8  }
   0xd   :  { %26 = dma.hbm_to_vmem [thread:$0]  %s475_s0, 256, %s21_s10, [#allocation9], %s400_s12, %s400_s12, %s401_s13  }
   0xe   :  { %s402_s16 = smov [#allocation11]  }
   0xf   :  { %s37_s17 = sshll.u32 %s402_s16, 4  ;;  %s38_s17 = int_to_ptr.vmem [resolvable:$true] %s37_s17 }
  0x10   :  { %s361_s18 = scalar_lea.vmem %s38_s17, 256  ;;  %p366_p6 = scmp.lt.s32.totalorder %s38_s17, %s38_s17 }
  0x11   :  { %p362_p5 = scmp.ne.s32.totalorder %s38_s17, %s361_s18  ;;  %p367_p7 = scmp.lt.s32.totalorder %s361_s18, %s361_s18 }
  0x13   :  { %p368_p8 = por %p367_p7, %p366_p6 }
  0x15   :  { %p369_p9 = pnand %p368_p8, %p362_p5 }
  0x17   :  { %372 = shalt.err (!%p369_p9)
}
  0x18   :  { %43 = dma.hbm_to_vmem [thread:$0]  %s476_s1, 256, %s38_s17, [#allocation12], %s400_s12, %s400_s12, %s401_s13  }
  0x19   :  { %393 = dma.done.wait [#allocation9], 256  }
  0x1a   :  { %394 = vsyncadd [#allocation9], 4294967040 }
  0x1b   :  { %395 = dma.done.wait [#allocation12], 256  }
  0x1c   :  { %396 = vsyncadd [#allocation12], 4294967040  ;;  %vm60_vm0 = vcmask 1024   ;;  %v403_v0 = vmov 0.0   ;;  %v67_v1 = vld [vmem:[#allocation8] sm:$0xff]  ;;  %v68_v2 = vld [vmem:[#allocation8 + $0x8] sm:$0xff] }
  0x1d   :  { %62 = vst.msk [vmem:[#allocation3] sm:$0x3] %vm60_vm0, %v403_v0  ;;  %61 = vst.msk [vmem:[#allocation2] sm:$0x3] %vm60_vm0, %v403_v0  ;;  %v437_v3 = vld [vmem:[#allocation11] sm:$0xff]  ;;  %v439_v4 = vld [vmem:[#allocation11 + $0x8] sm:$0xff]  ;;  %v99_v5 = vmul.f32 %v67_v1, %v67_v1  ;;  %v100_v6 = vmul.f32 %v68_v2, %v68_v2  ;;  %325 = vlog2.f32 %v67_v1 }
  0x1e   :  { %63 = vst.msk [vmem:[#allocation4] sm:$0x3] %vm60_vm0, %v403_v0  ;;  %64 = vst.msk [vmem:[#allocation5] sm:$0x3] %vm60_vm0, %v403_v0  ;;  %v101_v7 = vmul.f32 %v437_v3, %v437_v3  ;;  %v102_v8 = vmul.f32 %v439_v4, %v439_v4  ;;  %327 = vlog2.f32 %v68_v2  ;;  %v132_v9 = vsub.f32 1.0, %v67_v1  ;;  %s404_s0 = smov 1  }
  0x1f   :  { %65 = vst.msk [vmem:[#allocation6] sm:$0x3] %vm60_vm0, %v403_v0  ;;  %66 = vst.msk [vmem:[#allocation7] sm:$0x3] %vm60_vm0, %v403_v0  ;;  %v133_v10 = vsub.f32 1.0, %v68_v2  ;;  %vm146_vm1 = vcmp.gt.f32.partialorder %v437_v3, 0.5  ;;  %v72_v42 = vmul.f32 %v437_v3, %v67_v1  ;;  %v73_v46 = vmul.f32 %v439_v4, %v68_v2 }
  0x20   :  { %v103_v11 = vadd.f32 %v101_v7, %v99_v5  ;;  %v104_v12 = vadd.f32 %v102_v8, %v100_v6  ;;  %329 = vlog2.f32 %v132_v9  ;;  %vm147_vm2 = vcmp.gt.f32.partialorder %v439_v4, 0.5  ;;  %s405_s1 = smov 2   ;;  %s406_s21 = smov 3  }
  0x21   :  { %331 = vlog2.f32 %v133_v10  ;;  %vm148_vm3 = vcmp.lt.f32.partialorder %v437_v3, 0.5  ;;  %vm149_vm4 = vcmp.lt.f32.partialorder %v439_v4, 0.5  ;;  %vm88_vm5 = vcmask 1041409   ;;  %s407_s22 = smov 5   ;;  %s408_s23 = smov 4  }
  0x22   :  { %v105_v13 = vrot.slane %v103_v11, 4  ;;  %v111_v14 = vrot.slane %v104_v12, 4  ;;  %vm91_vm6 = vcmask 1041408   ;;  %v310_v27 = vsel %vm146_vm1, 1.0, %v403_v0  ;;  %s409_s24 = smov [#allocation13]  }
  0x23   :  { %v311_v28 = vsel %vm147_vm2, 1.0, %v403_v0  ;;  %v312_v31 = vsel %vm148_vm3, 1.0, %v403_v0  ;;  %v313_v32 = vsel %vm149_vm4, 1.0, %v403_v0  ;;  %v207_v34 = vrot.slane %v310_v27, 4  ;;  %s296_s25 = sshll.u32 %s409_s24, 4  ;;  %s297_s25 = int_to_ptr.vmem [resolvable:$true] %s296_s25 }
  0x24   :  { %v106_v15 = vadd.f32 %v105_v13, %v103_v11  ;;  %v112_v16 = vadd.f32 %v111_v14, %v104_v12  ;;  %v213_v35 = vrot.slane %v311_v28, 4  ;;  %v229_v36 = vrot.slane %v312_v31, 4  ;;  %s373_s26 = scalar_lea.vmem %s297_s25, 32  ;;  %p378_p11 = scmp.lt.s32.totalorder %s297_s25, %s297_s25 }
  0x25   :  { %v235_v37 = vrot.slane %v313_v32, 4  ;;  %v208_v49 = vadd.f32 %v310_v27, %v207_v34  ;;  %v74_v55 = vrot.slane %v72_v42, 4  ;;  %v80_v56 = vrot.slane %v73_v46, 4  ;;  %p374_p10 = scmp.ne.s32.totalorder %s297_s25, %s373_s26  ;;  %p379_p12 = scmp.lt.s32.totalorder %s373_s26, %s373_s26 }
  0x26   :  { %v107_v17 = vrot.slane %v106_v15, 2  ;;  %v113_v18 = vrot.slane %v112_v16, 2  ;;  %v214_v50 = vadd.f32 %v311_v28, %v213_v35  ;;  %v230_v52 = vadd.f32 %v312_v31, %v229_v36 }
  0x27   :  { %v236_v53 = vadd.f32 %v313_v32, %v235_v37  ;;  %v209_v59 = vrot.slane %v208_v49, 2  ;;  %v75_v1 = vadd.f32 %v74_v55, %v72_v42  ;;  %v81_v2 = vadd.f32 %v80_v56, %v73_v46  ;;  %p380_p13 = por %p379_p12, %p378_p11 }
  0x28   :  { %v108_v19 = vadd.f32 %v107_v17, %v106_v15  ;;  %v114_v20 = vadd.f32 %v113_v18, %v112_v16  ;;  %v215_v60 = vrot.slane %v214_v50, 2  ;;  %v231_v62 = vrot.slane %v230_v52, 2 }
  0x29   :  { %v237_v63 = vrot.slane %v236_v53, 2  ;;  %v210_v9 = vadd.f32 %v209_v59, %v208_v49  ;;  %v76_v15 = vrot.slane %v75_v1, 2  ;;  %v82_v16 = vrot.slane %v81_v2, 2  ;;  %p381_p0 = pnand %p380_p13, %p374_p10 }
  0x2a   :  { %v109_v21 = vrot.slane %v108_v19, 1  ;;  %v326_v22 = vpop.eup %325  ;;  %v115_v23 = vrot.slane %v114_v20, 1  ;;  %v216_v10 = vadd.f32 %v215_v60, %v214_v50  ;;  %v232_v13 = vadd.f32 %v231_v62, %v230_v52 }
  0x2b   :  { %v328_v24 = vpop.eup %327  ;;  %v127_v26 = vmul.f32 0.6931472, %v326_v22  ;;  %vm260_vm7 = vcmask 9224   ;;  %vm267_vm8 = vcmask 17424   ;;  %vm274_vm9 = vcmask 25624  }
  0x2c   :  { %v110_v25 = vadd.f32 %v109_v21, %v108_v19  ;;  %v116_v29 = vadd.f32 %v115_v23, %v114_v20  ;;  %v129_v30 = vmul.f32 0.6931472, %v328_v24  ;;  %v211_v21 = vrot.slane %v210_v9, 1 }
  0x2d   :  { %v330_v33 = vpop.eup %329  ;;  %v130_v40 = vmax.f32 %v127_v26, -100.0  ;;  %v217_v22 = vrot.slane %v216_v10, 1  ;;  %vm281_vm10 = vcmask 33824   ;;  %vm288_vm11 = vcmask 42024  }
  0x2e   :  { %v332_v38 = vpop.eup %331  ;;  %v119_v39 = vsel %vm88_vm5, %v116_v29, %v110_v25  ;;  %v135_v41 = vmul.f32 0.6931472, %v330_v33  ;;  %v131_v44 = vmax.f32 %v129_v30, -100.0  ;;  %v233_v25 = vrot.slane %v232_v13, 1 }
  0x2f   :  { %v121_v43 = vsel %vm91_vm6, %v119_v39, 0.0  ;;  %v137_v45 = vmul.f32 0.6931472, %v332_v38  ;;  %v77_v29 = vadd.f32 %v76_v15, %v75_v1  ;;  %v83_v30 = vadd.f32 %v82_v16, %v81_v2  ;;  %v158_v1 = vld [vmem:[#allocation4] sm:$0x3] }
  0x30   :  { %122 = vadd.xlane.f32.xlu0 %v121_v43  ;;  %v138_v47 = vmax.f32 %v135_v41, -100.0  ;;  %v212_v35 = vadd.f32 %v211_v21, %v210_v9  ;;  %v218_v36 = vadd.f32 %v217_v22, %v216_v10  ;;  %v234_v39 = vadd.f32 %v233_v25, %v232_v13  ;;  %v182_v2 = vld [vmem:[#allocation5] sm:$0x3]  ;;  %v206_v9 = vld [vmem:[#allocation6] sm:$0x3] }
  0x31   :  { %v139_v48 = vmax.f32 %v137_v45, -100.0  ;;  %v78_v43 = vrot.slane %v77_v29, 1  ;;  %v228_v10 = vld [vmem:[#allocation7] sm:$0x3] }
  0x32   :  { %v140_v51 = vsub.f32 %v130_v40, %v138_v47  ;;  %v221_v49 = vsel %vm88_vm5, %v218_v36, %v212_v35 }
  0x33   :  { %v141_v54 = vsub.f32 %v131_v44, %v139_v48  ;;  %v84_v44 = vrot.slane %v83_v30, 1 }
  0x34   :  { %v142_v57 = vmul.f32 %v140_v51, %v437_v3  ;;  %v238_v3 = vadd.f32 %v237_v63, %v236_v53  ;;  %v79_v53 = vadd.f32 %v78_v43, %v77_v29 }
  0x35   :  { %v143_v58 = vmul.f32 %v141_v54, %v439_v4  ;;  %v85_v54 = vadd.f32 %v84_v44, %v83_v30 }
  0x36   :  { %v144_v61 = vadd.f32 %v142_v57, %v138_v47  ;;  %v239_v26 = vrot.slane %v238_v3, 1  ;;  %v223_v57 = vsel %vm91_vm6, %v221_v49, 0.0 }
  0x37   :  { %v145_v0 = vadd.f32 %v143_v58, %v139_v48  ;;  %v89_v59 = vsel %vm88_vm5, %v85_v54, %v79_v53 }
  0x38   :  { %v159_v5 = vmul.f32 %v310_v27, %v144_v61  ;;  %v183_v6 = vmul.f32 %v312_v31, %v144_v61  ;;  %v240_v40 = vadd.f32 %v239_v26, %v238_v3  ;;  %v92_v60 = vsel %vm91_vm6, %v89_v59, 0.0  ;;  %v98_v61 = vld [vmem:[#allocation3] sm:$0x3] }
  0x39   :  { %v160_v7 = vmul.f32 %v311_v28, %v145_v0  ;;  %v184_v8 = vmul.f32 %v313_v32, %v145_v0 }
  0x3a   :  { %v161_v11 = vrot.slane %v159_v5, 4  ;;  %v185_v12 = vrot.slane %v183_v6, 4  ;;  %v243_v50 = vsel %vm88_vm5, %v240_v40, %v234_v39 }
  0x3b   :  { %v167_v14 = vrot.slane %v160_v7, 4  ;;  %v191_v4 = vrot.slane %v184_v8, 4  ;;  %v245_v58 = vsel %vm91_vm6, %v243_v50, 0.0 }
  0x3c   :  { %v162_v17 = vadd.f32 %v161_v11, %v159_v5  ;;  %v186_v18 = vadd.f32 %v185_v12, %v183_v6 }
  0x3d   :  { %v168_v19 = vadd.f32 %v167_v14, %v160_v7  ;;  %v192_v20 = vadd.f32 %v191_v4, %v184_v8  ;;  %v71_v14 = vld [vmem:[#allocation2] sm:$0x3] }
  0x3e   :  { %v163_v23 = vrot.slane %v162_v17, 2  ;;  %v187_v24 = vrot.slane %v186_v18, 2 }
  0x3f   :  { %v169_v27 = vrot.slane %v168_v19, 2  ;;  %v193_v28 = vrot.slane %v192_v20, 2 }
  0x40   :  { %v164_v31 = vadd.f32 %v163_v23, %v162_v17  ;;  %v188_v32 = vadd.f32 %v187_v24, %v186_v18 }
  0x41   :  { %v170_v33 = vadd.f32 %v169_v27, %v168_v19  ;;  %v194_v34 = vadd.f32 %v193_v28, %v192_v20 }
  0x42   :  { %v165_v37 = vrot.slane %v164_v31, 1  ;;  %v189_v38 = vrot.slane %v188_v32, 1 }
  0x43   :  { %v171_v41 = vrot.slane %v170_v33, 1  ;;  %v195_v42 = vrot.slane %v194_v34, 1 }
  0x44   :  { %v166_v45 = vadd.f32 %v165_v37, %v164_v31  ;;  %v190_v46 = vadd.f32 %v189_v38, %v188_v32 }
  0x45   :  { %v172_v47 = vadd.f32 %v171_v41, %v170_v33  ;;  %v196_v48 = vadd.f32 %v195_v42, %v194_v34 }
  0x47   :  { %v175_v51 = vsel %vm88_vm5, %v172_v47, %v166_v45  ;;  %v199_v52 = vsel %vm88_vm5, %v196_v48, %v190_v46 }
  0x48   :  { %v177_v55 = vsel %vm91_vm6, %v175_v51, 0.0  ;;  %v201_v56 = vsel %vm91_vm6, %v199_v52, 0.0 }
  0x49   :  { %178 = vadd.xlane.f32.xlu0 %v177_v55  ;;  %202 = vadd.xlane.f32.xlu1 %v201_v56 }
  0x4d   :  { %224 = vadd.xlane.f32.xlu1 %v223_v57  ;;  %246 = vadd.xlane.f32.xlu0 %v245_v58 }
  0x51   :  { %93 = vadd.xlane.f32.xlu1 %v92_v60 }
  0xb9   :  { %v123_v62 = vpop.xlane.xlu0 %122 }
  0xba   :  { %v124_v63 = vadd.f32 %v123_v62, %v98_v61 }
  0xbc   :  { %125 = vst.msk [vmem:[#allocation3] sm:$0x3] %vm60_vm0, %v124_v63 }
  0xc3   :  { %v255_v0 = vld [vmem:[#allocation3] sm:$0x3] }
  0xc4   :  { %257 = vrot.lane.b32.xlu0 %v255_v0, %s404_s0 }
  0xd2   :  { %v179_v5 = vpop.xlane.xlu0 %178  ;;  %v203_v6 = vpop.xlane.xlu1 %202 }
  0xd3   :  { %v180_v7 = vadd.f32 %v179_v5, %v158_v1  ;;  %v204_v8 = vadd.f32 %v203_v6, %v182_v2 }
  0xd5   :  { %181 = vst.msk [vmem:[#allocation4] sm:$0x3] %vm60_vm0, %v180_v7  ;;  %205 = vst.msk [vmem:[#allocation5] sm:$0x3] %vm60_vm0, %v204_v8 }
  0xd6   :  { %v225_v11 = vpop.xlane.xlu1 %224  ;;  %v247_v12 = vpop.xlane.xlu0 %246 }
  0xd7   :  { %v226_v13 = vadd.f32 %v225_v11, %v206_v9  ;;  %v248_v3 = vadd.f32 %v247_v12, %v228_v10 }
  0xd9   :  { %227 = vst.msk [vmem:[#allocation6] sm:$0x3] %vm60_vm0, %v226_v13  ;;  %249 = vst.msk [vmem:[#allocation7] sm:$0x3] %vm60_vm0, %v248_v3 }
  0xda   :  { %v94_v4 = vpop.xlane.xlu1 %93 }
  0xdb   :  { %v95_v15 = vadd.f32 %v94_v4, %v71_v14 }
  0xdc   :  { %v262_v16 = vld [vmem:[#allocation4] sm:$0x3]  ;;  %v269_v17 = vld [vmem:[#allocation5] sm:$0x3] }
  0xdd   :  { %264 = vrot.lane.b32.xlu1 %v262_v16, %s405_s1  ;;  %97 = vst.msk [vmem:[#allocation2] sm:$0x3] %vm60_vm0, %v95_v15 }
  0xe0   :  { %v283_v18 = vld [vmem:[#allocation7] sm:$0x3]  ;;  %v276_v19 = vld [vmem:[#allocation6] sm:$0x3] }
  0xe1   :  { %271 = vrot.lane.b32.xlu1 %v269_v17, %s406_s21  ;;  %285 = vrot.lane.b32.xlu0 %v283_v18, %s407_s22 }
  0xe4   :  { %v253_v20 = vld [vmem:[#allocation2] sm:$0x3] }
  0xe5   :  { %278 = vrot.lane.b32.xlu1 %v276_v19, %s408_s23  ;;  %254 = vst.msk [vmem:[#allocation13] sm:$0x3] %vm60_vm0, %v253_v20 }
 0x136   :  { %v258_v21 = vpop.permute.xlu0 %257 }
 0x137   :  { %261 = vst.msk [vmem:[#allocation13] sm:$0x3] %vm260_vm7, %v258_v21 }
 0x14f   :  { %v265_v22 = vpop.permute.xlu1 %264 }
 0x150   :  { %268 = vst.msk [vmem:[#allocation13] sm:$0x3] %vm267_vm8, %v265_v22 }
 0x153   :  { %v272_v23 = vpop.permute.xlu1 %271  ;;  %v286_v24 = vpop.permute.xlu0 %285 }
 0x154   :  { %275 = vst.msk [vmem:[#allocation13] sm:$0x3] %vm274_vm9, %v272_v23 }
 0x157   :  { %v279_v25 = vpop.permute.xlu1 %278 }
 0x158   :  { %282 = vst.msk [vmem:[#allocation13] sm:$0x3] %vm281_vm10, %v279_v25 }
 0x159   :  { %289 = vst.msk [vmem:[#allocation13] sm:$0x3] %vm288_vm11, %v286_v24 }
 0x15a   :  { %384 = shalt.err (!%p381_p0)
}
 0x15b   :  { %299 = dma.vmem_to_hbm [thread:$0]  %s297_s25, 32, %s477_s2, [#allocation10]  }
 0x15c   :  { %397 = dma.done.wait [#allocation10], 32  }
 0x15d   :  { %398 = vsyncadd [#allocation10], 4294967264 }
 0x15e   :  { %303 = vsyncpa [#allocation9], 1 }
 0x15f   :  { %304 = vsyncpa [#allocation12], 1 }
 0x160   :  { %305 = vsyncpa [#allocation10], 1 }

</bundles_post_ra>
